<compile_context>
chip_gen: v6e
topology: v6e:2x2x1
jax: 0.10.0
libtpu: 0.0.40
codegen_flags: <defaults>
</compile_context>

<pallas_src>
import jax
import jax.numpy as jnp
import numpy as np
from jax.experimental import pallas as pl
from jax.experimental.pallas import tpu as pltpu

INPUT_SIZE = 7
LANE = 128

# Row layout of the packed parameter buffer, shape (_N_ROWS, 3*128) f32 (~216 KiB):
#   rows [0, 7)        : W_ih^T with the f block dropped; gate g at lane slot
#                        [0,128) = i, [128,256) = g, [256,384) = o, each
#                        zero-padded past column H.
#   row  7             : b_ih + b_hh in the same per-slot layout.
#   rows [8, 136)      : W_fc^T zero-padded to (128, 128) in lanes [0, 128);
#                        real data at rows [8, 8+H), lanes [0, 7).
#   row  136           : b_fc zero-padded to 128 lanes.
_B1_ROW = INPUT_SIZE            # 7
_W2_ROW0 = 8
_B2_ROW = _W2_ROW0 + LANE       # 136
_N_ROWS = ((_B2_ROW + 1 + 7) // 8) * 8   # 144
_N_COLS = 3 * LANE              # 384


def _hour_lstm_kernel(x_ref, p_ref, out_ref):
    x = x_ref[...]                                                     # (B, 7)

    # Gate stage: gates = x @ W1 + b1, gate blocks on 128-lane boundaries.
    w1 = p_ref[0:INPUT_SIZE, :]                                        # (7, 384)
    b1 = p_ref[_B1_ROW:_B1_ROW + 1, :]                                 # (1, 384)
    gates = jnp.dot(x, w1, preferred_element_type=jnp.float32) + b1    # (B, 384)

    # Vreg-boundary slices (lanes 0/128/256) — free vreg picks, no lane masking.
    i_g = jax.nn.sigmoid(gates[:, 0:LANE])
    g_g = jnp.tanh(gates[:, LANE:2 * LANE])
    o_g = jax.nn.sigmoid(gates[:, 2 * LANE:3 * LANE])

    # c0 == 0  =>  c1 = f*c0 + i*g == i*g (f-gate eliminated).
    # Padding lanes: sigmoid(0)*tanh(0) == 0, so they stay exactly zero.
    c1 = i_g * g_g
    h1 = o_g * jnp.tanh(c1)

    # Output stage: fc(tanh(h1)).  Lane-dense (B, 128) store; real data in
    # lanes [0, 7), padding lanes are exact zeros.
    w2 = p_ref[_W2_ROW0:_W2_ROW0 + LANE, 0:LANE]                       # (128, 128)
    b2 = p_ref[_B2_ROW:_B2_ROW + 1, 0:LANE]                            # (1, 128)
    out = jnp.dot(jnp.tanh(h1), w2, preferred_element_type=jnp.float32) + b2
    out_ref[...] = out.astype(out_ref.dtype)                           # (B, 128)


def pack_params(params):
    """One-time packing of all HourLSTM parameters into a single VMEM payload."""
    H = params["w_hh"].shape[1]
    assert H <= LANE, "packed layout assumes hidden_size <= 128"

    wih_t = params["w_ih"].T                       # (7, 4H), column blocks [i|f|g|o]
    b_all = params["b_ih"] + params["b_hh"]        # (4H,)

    p = jnp.zeros((_N_ROWS, _N_COLS), jnp.float32)
    # Gate weights: drop the f block (it only multiplies c0 == 0); put i/g/o
    # each at its own 128-lane slot so kernel gate slices are vreg-aligned.
    p = p.at[0:INPUT_SIZE, 0:H].set(wih_t[:, 0:H])                        # i
    p = p.at[0:INPUT_SIZE, LANE:LANE + H].set(wih_t[:, 2 * H:3 * H])      # g
    p = p.at[0:INPUT_SIZE, 2 * LANE:2 * LANE + H].set(wih_t[:, 3 * H:4 * H])  # o
    p = p.at[_B1_ROW, 0:H].set(b_all[0:H])
    p = p.at[_B1_ROW, LANE:LANE + H].set(b_all[2 * H:3 * H])
    p = p.at[_B1_ROW, 2 * LANE:2 * LANE + H].set(b_all[3 * H:4 * H])
    # fc weight / bias (zero-padded to a dense 128x128 / 128-lane row).
    p = p.at[_W2_ROW0:_W2_ROW0 + H, 0:INPUT_SIZE].set(params["w_fc"].T)
    p = p.at[_B2_ROW, 0:INPUT_SIZE].set(params["b_fc"])
    return p


def hour_lstm_forward_steps(x_steps, packed_params):
    """Fused execution of T independent HourLSTM forward calls.

    x_steps: (T, B, 7) float32. Returns (T, B, 128) float32 lane-dense slab;
    real outputs live in lanes [0, 7), padding lanes are zero.  B should be a
    multiple of 8 for unmasked sublane loads/stores (any B is still correct).
    """
    T, B, _ = x_steps.shape
    return pl.pallas_call(
        _hour_lstm_kernel,
        out_shape=jax.ShapeDtypeStruct((T, B, LANE), jnp.float32),
        grid=(T,),
        in_specs=[
            # x: one step per grid point (leading dim squeezed out).
            pl.BlockSpec((None, B, INPUT_SIZE), lambda t: (t, 0, 0)),
            # params: constant block index => DMA'd once, resident across steps.
            pl.BlockSpec((_N_ROWS, _N_COLS), lambda t: (0, 0)),
        ],
        out_specs=pl.BlockSpec((None, B, LANE), lambda t: (t, 0, 0)),
        compiler_params=pltpu.CompilerParams(
            dimension_semantics=("parallel",)),  # steps independent -> 2-TC shard on v7x
    )(x_steps, packed_params)


def hour_lstm_forward(x, packed_params):
    """Single-call convenience matching the nn.Module forward: (B, 7) -> (B, 128)."""
    return hour_lstm_forward_steps(x[None], packed_params)[0]


def init_params(key, hidden_size):
    """Deterministic init mimicking PyTorch's U(-1/sqrt(H), 1/sqrt(H))."""
    k = 1.0 / np.sqrt(hidden_size)
    keys = jax.random.split(key, 6)
    u = lambda kk, shape: jax.random.uniform(kk, shape, jnp.float32, -k, k)
    return {
        "w_ih": u(keys[0], (4 * hidden_size, INPUT_SIZE)),
        "w_hh": u(keys[1], (4 * hidden_size, hidden_size)),
        "b_ih": u(keys[2], (4 * hidden_size,)),
        "b_hh": u(keys[3], (4 * hidden_size,)),
        "w_fc": u(keys[4], (INPUT_SIZE, hidden_size)),
        "b_fc": u(keys[5], (INPUT_SIZE,)),
    }


def hour_lstm_reference(x, params):
    """Pure-JAX reference keeping the FULL LSTMCell math (zero h0/c0 explicit),
    so the kernel's zero-state algebraic simplification is verified against it."""
    B = x.shape[0]
    H = params["w_hh"].shape[1]
    h0 = jnp.zeros((B, H), jnp.float32)
    c0 = jnp.zeros((B, H), jnp.float32)
    gates = (x @ params["w_ih"].T + params["b_ih"]
             + h0 @ params["w_hh"].T + params["b_hh"])
    i_g, f_g, g_g, o_g = jnp.split(gates, 4, axis=-1)
    c1 = jax.nn.sigmoid(f_g) * c0 + jax.nn.sigmoid(i_g) * jnp.tanh(g_g)
    h1 = jax.nn.sigmoid(o_g) * jnp.tanh(c1)
    return jnp.tanh(h1) @ params["w_fc"].T + params["b_fc"]


if __name__ == "__main__":
    key = jax.random.PRNGKey(0)
    hidden_size = 32
    batch = 8     # multiple of 8 sublanes -> unmasked loads/stores
    steps = 8     # number of independent forward calls fused into one pallas_call

    pkey, xkey = jax.random.split(key)
    params = init_params(pkey, hidden_size)
    x = jax.random.normal(xkey, (steps, batch, INPUT_SIZE), jnp.float32)

    # One-time parameter packing (outside the per-call path).
    packed = jax.block_until_ready(pack_params(params))

    # Fused multi-step call (grid over steps, params resident in VMEM).
    fwd = jax.jit(hour_lstm_forward_steps)
    out_padded = jax.block_until_ready(fwd(x, packed))
    assert out_padded.shape == (steps, batch, LANE)

    # Reference: each step is an independent zero-state forward call.
    ref = hour_lstm_reference(x.reshape(steps * batch, INPUT_SIZE), params)
    ref = ref.reshape(steps, batch, INPUT_SIZE)
    np.testing.assert_allclose(np.asarray(out_padded[..., :INPUT_SIZE]),
                               np.asarray(ref), rtol=1e-5, atol=1e-5)
    # Padding lanes of the lane-dense slab must be (numerically) zero.
    np.testing.assert_allclose(np.asarray(out_padded[..., INPUT_SIZE:]), 0.0, atol=1e-6)

    # Single-call path (matches the original nn.Module forward signature).
    out_single = jax.block_until_ready(hour_lstm_forward(x[0], packed))
    np.testing.assert_allclose(np.asarray(out_single[:, :INPUT_SIZE]),
                               np.asarray(ref[0]), rtol=1e-5, atol=1e-5)

    print("KERNEL_OK")
</pallas_src>

<mosaic_0001>
module attributes {stable_mosaic.version = 11 : i64} {
  func.func @_hour_lstm_kernel(%arg0: i32, %arg1: memref<1x8x7xf32, #tpu.memory_space<vmem>>, %arg2: memref<144x384xf32, #tpu.memory_space<vmem>>, %arg3: memref<1x8x128xf32, #tpu.memory_space<vmem>>) attributes {dimension_semantics = [#tpu.dimension_semantics<parallel>], iteration_bounds = array<i64: 8>, scalar_prefetch = 0 : i64, scratch_operands = 0 : i64, tpu.core_type = #tpu.core_type<tc>, window_params = [{transform_indices = @transform_0, window_bounds = array<i64: 1, 8, 7>}, {pipeline_mode = #tpu.pipeline_mode<synchronous>, transform_indices = @transform_1, window_bounds = array<i64: 144, 384>}, {transform_indices = @transform_2, window_bounds = array<i64: 1, 8, 128>}]} {
    %c0 = arith.constant 0 : index
    %c0_0 = arith.constant 0 : index
    %c0_1 = arith.constant 0 : index
    %0 = vector.load %arg1[%c0, %c0_0, %c0_1] : memref<1x8x7xf32, #tpu.memory_space<vmem>>, vector<1x8x7xf32>
    %1 = vector.shape_cast %0 : vector<1x8x7xf32> to vector<8x7xf32>
    %c0_2 = arith.constant 0 : index
    %c0_3 = arith.constant 0 : index
    %2 = vector.load %arg2[%c0_2, %c0_3] : memref<144x384xf32, #tpu.memory_space<vmem>>, vector<7x384xf32>
    %c7 = arith.constant 7 : index
    %c0_4 = arith.constant 0 : index
    %3 = vector.load %arg2[%c7, %c0_4] : memref<144x384xf32, #tpu.memory_space<vmem>>, vector<1x384xf32>
    %cst = arith.constant dense<0.000000e+00> : vector<8x384xf32>
    %4 = tpu.matmul %1, %2, %cst {dimension_numbers = #tpu.dot_dimension_numbers<[1], [0], [0], [1], [0, 0, 1, 1], [], []>} : vector<8x7xf32>, vector<7x384xf32>, vector<8x384xf32> -> vector<8x384xf32>
    %5 = vector.broadcast %3 : vector<1x384xf32> to vector<8x384xf32>
    %6 = arith.addf %4, %5 : vector<8x384xf32>
    %7 = vector.extract_strided_slice %6 {offsets = [0, 0], sizes = [8, 128], strides = [1, 1]} : vector<8x384xf32> to vector<8x128xf32>
    %8 = arith.negf %7 : vector<8x128xf32>
    %9 = math.exp %8 : vector<8x128xf32>
    %cst_5 = arith.constant 1.000000e+00 : f32
    %10 = vector.broadcast %cst_5 : f32 to vector<8x128xf32>
    %11 = arith.addf %10, %9 : vector<8x128xf32>
    %12 = arith.divf %10, %11 : vector<8x128xf32>
    %13 = vector.extract_strided_slice %6 {offsets = [0, 128], sizes = [8, 128], strides = [1, 1]} : vector<8x384xf32> to vector<8x128xf32>
    %14 = math.tanh %13 : vector<8x128xf32>
    %15 = vector.extract_strided_slice %6 {offsets = [0, 256], sizes = [8, 128], strides = [1, 1]} : vector<8x384xf32> to vector<8x128xf32>
    %16 = arith.negf %15 : vector<8x128xf32>
    %17 = math.exp %16 : vector<8x128xf32>
    %cst_6 = arith.constant 1.000000e+00 : f32
    %18 = vector.broadcast %cst_6 : f32 to vector<8x128xf32>
    %19 = arith.addf %18, %17 : vector<8x128xf32>
    %20 = arith.divf %18, %19 : vector<8x128xf32>
    %21 = arith.mulf %12, %14 : vector<8x128xf32>
    %22 = math.tanh %21 : vector<8x128xf32>
    %23 = arith.mulf %20, %22 : vector<8x128xf32>
    %c8 = arith.constant 8 : index
    %c0_7 = arith.constant 0 : index
    %24 = vector.load %arg2[%c8, %c0_7] : memref<144x384xf32, #tpu.memory_space<vmem>>, vector<128x128xf32>
    %c136 = arith.constant 136 : index
    %c0_8 = arith.constant 0 : index
    %25 = vector.load %arg2[%c136, %c0_8] : memref<144x384xf32, #tpu.memory_space<vmem>>, vector<1x128xf32>
    %26 = math.tanh %23 : vector<8x128xf32>
    %cst_9 = arith.constant dense<0.000000e+00> : vector<8x128xf32>
    %27 = tpu.matmul %26, %24, %cst_9 {dimension_numbers = #tpu.dot_dimension_numbers<[1], [0], [0], [1], [0, 0, 1, 1], [], []>} : vector<8x128xf32>, vector<128x128xf32>, vector<8x128xf32> -> vector<8x128xf32>
    %28 = vector.broadcast %25 : vector<1x128xf32> to vector<8x128xf32>
    %29 = arith.addf %27, %28 : vector<8x128xf32>
    %c0_10 = arith.constant 0 : index
    %c0_11 = arith.constant 0 : index
    %c0_12 = arith.constant 0 : index
    %30 = vector.load %arg3[%c0_10, %c0_11, %c0_12] : memref<1x8x128xf32, #tpu.memory_space<vmem>>, vector<1x8x128xf32>
    %31 = vector.shape_cast %30 : vector<1x8x128xf32> to vector<8x128xf32>
    %32 = vector.shape_cast %29 : vector<8x128xf32> to vector<1x8x128xf32>
    tpu.vector_store %arg3[%c0_10, %c0_11, %c0_12], %32 {strides = array<i32>} : memref<1x8x128xf32, #tpu.memory_space<vmem>>, vector<1x8x128xf32>,
    return
  }
  func.func @transform_0(%arg0: i32) -> (i32, i32, i32) {
    %c0_i32 = arith.constant 0 : i32
    %c0_i32_0 = arith.constant 0 : i32
    %c0_i32_1 = arith.constant 0 : i32
    return %arg0, %c0_i32, %c0_i32_0 : i32, i32, i32
  }
  func.func @transform_1(%arg0: i32) -> (i32, i32) {
    %c0_i32 = arith.constant 0 : i32
    %c0_i32_0 = arith.constant 0 : i32
    %c0_i32_1 = arith.constant 0 : i32
    return %c0_i32, %c0_i32_0 : i32, i32
  }
  func.func @transform_2(%arg0: i32) -> (i32, i32, i32) {
    %c0_i32 = arith.constant 0 : i32
    %c0_i32_0 = arith.constant 0 : i32
    %c0_i32_1 = arith.constant 0 : i32
    return %arg0, %c0_i32, %c0_i32_0 : i32, i32, i32
  }
}

</mosaic_0001>

<bundles_post_ra>
// kernel: hour_lstm_forward_steps.1
= control target key start
LH: loop header
LB: loop body
LE: loop exit
PB: predicated region body
PF: predicated region fallthrough
CT: control target
= control target key end

     0   :  { %7 = vsyncpa [#allocation3], 0  ;;  %s911_s0 = inlined_call_operand.vmem [shape: f32[8,8,7], index: 0, kind: input, shape index: {}]   ;;  %s912_s1 = inlined_call_operand.hbm [shape: f32[144,384], index: 1, kind: input, shape index: {}]   ;;  %s913_s2 = inlined_call_operand.hbm [shape: f32[8,8,128], index: 2, kind: output, shape index: {}]  }
   0x1   :  { %8 = vsyncpa [#allocation4], 0 }
   0x2   :  { %10 = vsyncpa [#allocation4 + $0x1], 0  ;;  %s780_s9 = smov 0   ;;  %s782_s10 = smov 0  }
   0x3   :  { %s784_s11 = smov 0   ;;  %s786_s12 = smov 0  }
   0x4 LB: > { %s801_s13 = sadd.s32 4294967295, %s757_s12   ;;  %s521_s14 = sadd.s32 4294967294, %s757_s12   ;;  %s757_s12 = sphi %s786_s12, %s921_s12   ;;  %s753_s11 = sphi %s784_s11, %s920_s11   ;;  %s749_s10 = sphi %s782_s10, %s919_s10   ;;  %s745_s9 = sphi %s780_s9, %s918_s9  }
   0x5   : > { %s805_s15 = sadd.s32 1, %s757_s12   ;;  %s70_s16 = sadd.s32 1, %s753_s11 }
   0x6   : > { %s67_s17 = ssub.s32 %s757_s12, %s805_s15  ;;  %p80_p0 = scmp.ne.s32.totalorder %s753_s11, %s749_s10 }
   0x7   : > { %p68_p1 = scmp.eq.s32.totalorder %s67_s17, 0  ;;  %p81_p2 = scmp.eq.s32.totalorder %s801_s13, 7 }
   0x8   : > { %p86_p3 = scmp.ne.s32.totalorder %s749_s10, %s745_s9  ;;  %p87_p4 = scmp.eq.s32.totalorder %s521_s14, 7 }
   0x9   : > { %s816_s18 = scalar_select %p68_p1, %s753_s11, %s70_s16  }
   0xa   : > { %p818_p5 = por %p81_p2, %p80_p0  ;;  %p822_p6 = por %p87_p4, %p86_p3 }
   0xb   : > { %p522_p7 = scmp.ge.s32.totalorder %s757_s12, 1  ;;  %p94_p8 = scmp.lt.s32.totalorder %s757_s12, 9 }
   0xc   : > { %s915_s20 = scalar_select %p822_p6, 1, 0 }
   0xd   : > { %p613_p9 = scmp.eq.s32.totalorder %s801_s13, 0  ;;  %p829_p10 = pnand %p522_p7, %p94_p8 }
   0xe   : > { %s759_s22 = smov [#allocation2]  }
   0xf   : > { %s106_s23 = sshll.u32 %s759_s22, 4  ;;  %p605_p11 = pneg %p829_p10  ;;  %s107_s23 = int_to_ptr.vmem [resolvable:$true] %s106_s23 }
  0x10   : > { %s678_s24 = scalar_lea.vmem %s107_s23, 6912  ;;  %p686_p3 = scmp.lt.s32.totalorder %s107_s23, %s107_s23 }
  0x11   : > { %p606_p12 = pnand %p613_p9, %p605_p11  ;;  %p679_p0 = scmp.ne.s32.totalorder %s107_s23, %s678_s24 }
  0x12   : > { %p687_p4 = scmp.lt.s32.totalorder %s678_s24, %s678_s24 }
  0x13   : > { %p669_p13 = pneg %p606_p12 }
  0x14   : > { %p688_p6 = por %p687_p4, %p686_p3 }
  0x15   : > { %p681_p1 = pnand %p679_p0, %p669_p13 }
  0x17   : > { %p682_p2 = pneg %p681_p1 }
  0x19   : > { %p689_p7 = pnand %p688_p6, %p682_p2 }
  0x1b   : > { %692 = shalt.err (!%p689_p7)
}
  0x1c   : > { %s760_s25 = smov 384   ;;  %s761_s26 = smov 24  }
  0x1d   : > { %608 = dma.hbm_to_vmem [thread:$0]  (!%p606_p12), %s912_s1, 6912, %s107_s23, [#allocation3], %s760_s25, %s760_s25, %s761_s26  }
  0x1e   : > { %129 = sbr.rel (%p829_p10) target bundleno = 510 (0x1fe), region = 28 }
  0x23   : > { %736 = dma.done.wait (%p613_p9), [#allocation3], 6912  }
  0x24   : > { %738 = vsyncadd (%p613_p9), [#allocation3], 4294960384  ;;  %p150_p8 = scmp.lt.s32.totalorder %s801_s13, 7  ;;  %v762_v0 = vmov 0.0   ;;  %vm763_vm0 = vmmov 0   ;;  %vm180_vm1 = vcmask 1046528   ;;  %v161_v21 = vlaneseq }
  0x25   : > { %254 = vmatprep.mubr.f32.mxu1 %v762_v0  ;;  %564 = vmatprep.subr.mxu0 %v762_v0  ;;  %v156_v1 = vld [vmem:[#allocation2 + $0x8] sm:$0x7f]  ;;  %v155_v2 = vld [vmem:[#allocation2] sm:$0x7f]  ;;  %vm176_vm2 = vcmask 56320   ;;  %v360_v7 = vld [vmem:[#allocation2 + $0x150] sm:$0xff] }
  0x26   : > { %s151_s29 = scalar_select %p150_p8, %s801_s13, 7  ;;  %596 = vmatprep.mubr.msk.f32.mxu0 %vm763_vm0, %v762_v0  ;;  %529 = vmatprep.subr.msk.mxu1 %vm180_vm1, %v156_v1  ;;  %v157_v4 = vld [vmem:[#allocation2 + $0x10] sm:$0x7f]  ;;  %v362_v5 = vld [vmem:[#allocation2 + $0x180] sm:$0xff]  ;;  %v361_v6 = vld [vmem:[#allocation2 + $0x168] sm:$0xff]  ;;  %v162_v22 = vshrl.u32 %v161_v21, 7 }
  0x27   : > { %530 = vmatpush1.msk.msra.mxu1 %vm180_vm1, %v155_v2  ;;  %565 = vmatpush3.msra.mxu0 %v362_v5  ;;  %v359_v8 = vld [vmem:[#allocation2 + $0x138] sm:$0xff]  ;;  %v358_v9 = vld [vmem:[#allocation2 + $0x120] sm:$0xff]  ;;  %v357_v10 = vld [vmem:[#allocation2 + $0x108] sm:$0xff]  ;;  %s147_s6 = sand.u32 1, %s749_s10   ;;  %s537_s8 = sshll.u32 %s801_s13, 7 }
  0x28   : > { %s528_s30 = sshll.u32 %s151_s29, 3  ;;  %559 = vmatprep.subr.mxu1 %v762_v0  ;;  %566 = vmatprep.subr.mxu0 %v762_v0  ;;  %v356_v11 = vld [vmem:[#allocation2 + $0xf0] sm:$0xff]  ;;  %v355_v12 = vld [vmem:[#allocation2 + $0xd8] sm:$0xff]  ;;  %v354_v13 = vld [vmem:[#allocation2 + $0xc0] sm:$0xff]  ;;  %v163_v23 = vsub.s32 0, %v162_v22  ;;  %v171_v26 = vsub.s32 2, %v162_v22  ;;  %s876_s22 = scalar_lea.hbm %s913_s2, %s537_s8 }
  0x29   : > { %s153_s5 = scalar_lea.vmem %s911_s0, %s528_s30  ;;  %567 = vmatpush3.msra.mxu0 %v361_v6  ;;  %v353_v14 = vld [vmem:[#allocation2 + $0xa8] sm:$0xff]  ;;  %v352_v15 = vld [vmem:[#allocation2 + $0x90] sm:$0xff]  ;;  %v351_v16 = vld [vmem:[#allocation2 + $0x78] sm:$0xff]  ;;  %v167_v35 = vsub.s32 1, %v162_v22  ;;  %s527_s7 = sshll.u32 %s147_s6, 3 }
  0x2a   : > { %v154_v3 = vld [vmem:[%s153_s5] sm:$0xff]  ;;  %568 = vmatprep.subr.mxu0 %v762_v0  ;;  %v349_v18 = vld [vmem:[#allocation2 + $0x48] sm:$0xff]  ;;  %v348_v19 = vld [vmem:[#allocation2 + $0x30] sm:$0xff]  ;;  %s149_s14 = scalar_lea.vmem [#allocation5], %s527_s7  ;;  %s437_s23 = scalar_lea.sflag [#allocation4], %s147_s6 }
  0x2b   : > { %531 = vmatmul.mubr.msk.f32.vlgmr.msra.gmra.mxu1 %vm176_vm2, %v154_v3  ;;  %569 = vmatpush3.msra.mxu0 %v360_v7  ;;  %v350_v17 = vld [vmem:[#allocation2 + $0x60] sm:$0xff]  ;;  %v347_v20 = vld [vmem:[#allocation2 + $0x18] sm:$0xff]  ;;  %s450_s16 = sshll.u32 %s149_s14, 4  ;;  %s764_s25 = smov [#allocation5]   ;;  %s451_s16 = int_to_ptr.vmem [resolvable:$true] %s450_s16 }
  0x2c   : > { %560 = vmatpush3.msk.msra.mxu1 %vm180_vm1, %v157_v4  ;;  %561 = vmatprep.mubr.msk.f32.mxu1 %vm763_vm0, %v762_v0  ;;  %v159_v24 = vld [vmem:[#allocation2 + $0x7] ss:$8 sm:$0x7]  ;;  %v363_v50 = vld [vmem:[#allocation2 + $0x198] ss:$0 sm:$0xff]  ;;  %s693_s24 = scalar_lea.vmem %s451_s16, 128 }
  0x2d   : > { %570 = vmatprep.subr.mxu0 %v762_v0  ;;  %v164_v25 = vrot.slane %v159_v24, %v163_v23  ;;  %v172_v31 = vrot.slane %v159_v24, %v171_v26  ;;  %v168_v37 = vrot.slane %v159_v24, %v167_v35  ;;  %p694_p6 = scmp.ne.s32.totalorder %s451_s16, %s693_s24  ;;  %s697_s13 = sshll.u32 %s764_s25, 4  ;;  %s698_s13 = int_to_ptr.vmem [resolvable:$false] %s697_s13 }
  0x2e   : > { %571 = vmatpush3.msra.mxu0 %v359_v8  ;;  %s699_s26 = scalar_lea.vmem %s698_s13, 256  ;;  %p700_p11 = scmp.lt.s32.totalorder %s451_s16, %s698_s13 }
  0x2f   : > { %562 = vmatmul.mubr.msk.f32.vlgmr.msra.gmra.mxu1 %vm176_vm2, %v154_v3  ;;  %572 = vmatprep.subr.mxu0 %v762_v0  ;;  %p695_p9 = pnand %p694_p6, %p818_p5  ;;  %p701_p12 = scmp.lt.s32.totalorder %s699_s26, %s693_s24 }
  0x30   : > { %573 = vmatpush3.msra.mxu0 %v358_v9 }
  0x31   : > { %574 = vmatprep.subr.mxu0 %v762_v0  ;;  %p696_p10 = pneg %p695_p9  ;;  %p702_p13 = por %p701_p12, %p700_p11 }
  0x32   : > { %575 = vmatpush3.msra.mxu0 %v357_v10 }
  0x33   : > { %576 = vmatprep.subr.mxu0 %v762_v0  ;;  %p703_p0 = pnand %p702_p13, %p696_p10 }
  0x34   : > { %577 = vmatpush3.msra.mxu0 %v356_v11 }
  0x35   : > { %578 = vmatprep.subr.mxu0 %v762_v0 }
  0x36   : > { %579 = vmatpush3.msra.mxu0 %v355_v12 }
  0x37   : > { %580 = vmatprep.subr.mxu0 %v762_v0 }
  0x38   : > { %581 = vmatpush3.msra.mxu0 %v354_v13 }
  0x39   : > { %582 = vmatprep.subr.mxu0 %v762_v0 }
  0x3a   : > { %583 = vmatpush3.msra.mxu0 %v353_v14 }
  0x3b   : > { %584 = vmatprep.subr.mxu0 %v762_v0 }
  0x3c   : > { %585 = vmatpush3.msra.mxu0 %v352_v15 }
  0x3d   : > { %586 = vmatprep.subr.mxu0 %v762_v0 }
  0x3e   : > { %587 = vmatpush3.msra.mxu0 %v351_v16 }
  0x3f   : > { %588 = vmatprep.subr.mxu0 %v762_v0 }
  0x40   : > { %589 = vmatpush3.msra.mxu0 %v350_v17 }
  0x41   : > { %590 = vmatprep.subr.mxu0 %v762_v0 }
  0x42   : > { %591 = vmatpush3.msra.mxu0 %v349_v18 }
  0x43   : > { %592 = vmatprep.subr.mxu0 %v762_v0 }
  0x44   : > { %593 = vmatpush3.msra.mxu0 %v348_v19 }
  0x45   : > { %594 = vmatprep.subr.mxu0 %v762_v0 }
  0x46   : > { %595 = vmatpush3.msra.mxu0 %v347_v20 }
  0xeb   : > { %v256_v27 = vpop.f32.mrf.mxu1 }
  0xec   : > { %v257_v28 = vadd.f32 %v256_v27, %v164_v25 }
  0xed   : > { %v258_v29 = vpop.f32.mrf.mxu1 }
  0xee   : > { %v534_v30 = vmul.f32 -1.442695, %v257_v28  ;;  %v259_v38 = vadd.f32 %v258_v29, %v168_v37 }
  0xef   : > { %v327_v32 = vpop.f32.mrf.mxu1 }
  0xf0   : > { %653 = vpow2.f32 %v534_v30  ;;  %v328_v34 = vadd.f32 %v327_v32, %v172_v31 }
  0xf1   : > { %v563_v33 = vpop.f32.mrf.mxu1 }
  0xf2   : > { %v535_v36 = vmul.f32 -1.442695, %v328_v34 }
  0xf4   : > { %655 = vpow2.f32 %v535_v36 }
  0xf5   : > { %657 = vtanh.f32 %v259_v38 }
  0xfd   : > { %v654_v39 = vpop.eup %653 }
  0xfe   : > { %v334_v40 = vadd.f32 1.0, %v654_v39 }
 0x100   : > { %659 = vrcp.f32 %v334_v40 }
 0x101   : > { %v656_v41 = vpop.eup %655 }
 0x102   : > { %v341_v42 = vadd.f32 1.0, %v656_v41  ;;  %v658_v43 = vpop.eup %657 }
 0x104   : > { %661 = vrcp.f32 %v341_v42 }
 0x10d   : > { %v660_v44 = vpop.eup %659 }
 0x10e   : > { %v344_v45 = vmul.f32 %v660_v44, %v658_v43 }
 0x110   : > { %663 = vtanh.f32 %v344_v45 }
 0x111   : > { %v662_v46 = vpop.eup %661 }
 0x11d   : > { %v664_v47 = vpop.eup %663 }
 0x11e   : > { %v346_v48 = vmul.f32 %v664_v47, %v662_v46 }
 0x120   : > { %665 = vtanh.f32 %v346_v48 }
 0x12d   : > { %v666_v49 = vpop.eup %665 }
 0x12e   : > { %597 = vmatmul.mubr.f32.vlgmr.msra.gmra.mxu0 %v666_v49 }
 0x1ee   : > { %v431_v51 = vpop.f32.mrf.mxu0 }
 0x1ef   : > { %v432_v52 = vadd.f32 %v431_v51, %v363_v50 }
 0x1f0   : > { %v598_v53 = vpop.f32.mrf.mxu0 }
 0x1f1   : > { %435 = vst [vmem:[%s149_s14] sm:$0xff] %v432_v52 }
 0x1f2   : > { %706 = shalt.err (!%p703_p0)
}
 0x1f3   : > { %s707_s27 = scalar_lea.hbm %s876_s22, 128  ;;  %s711_s30 = scalar_lea.hbm %s913_s2, 1024 }
 0x1f4   : > { %p708_p1 = scmp.ne.s32.totalorder %s876_s22, %s707_s27  ;;  %p712_p4 = scmp.lt.s32.totalorder %s876_s22, %s913_s2 }
 0x1f5   : > { %p713_p7 = scmp.lt.s32.totalorder %s711_s30, %s707_s27 }
 0x1f6   : > { %p709_p2 = pnand %p708_p1, %p818_p5 }
 0x1f7   : > { %p714_p8 = por %p713_p7, %p712_p4 }
 0x1f8   : > { %p710_p3 = pneg %p709_p2 }
 0x1fa   : > { %p715_p6 = pnand %p714_p8, %p710_p3 }
 0x1fc   : > { %718 = shalt.err (!%p715_p6)
}
 0x1fd   : > { %603 = dma.vmem_to_hbm [thread:$0]  (%p818_p5), %s451_s16, 128, %s876_s22, %s437_s23  }
 0x1fe PF: > { %p615_p9 = scmp.ge.s32.totalorder %s757_s12, 2  ;;  %s462_s5 = sand.u32 1, %s745_s9  }
 0x1ff   : > { %p917_p10 = scmp.ne.s32.totalorder %s915_s20, 0  ;;  %s463_s6 = scalar_lea.sflag [#allocation4], %s462_s5 }
 0x201   : > { %p610_p11 = pnand %p615_p9, %p917_p10 }
 0x203   : > { %p611_p12 = pneg %p610_p11 }
 0x205   : > { %740 = dma.done.wait (%p611_p12), %s463_s6, 128  }
 0x206   : > { %742 = vsyncadd (%p611_p12), %s463_s6, 4294967168  ;;  %p13_p13 = scmp.ge.s32.totalorder %s805_s15, 10   ;;  %s918_s9 = smov %s749_s10 }
 0x207   : > { %s919_s10 = smov %s753_s11  ;;  %s920_s11 = smov %s816_s18 }
 0x208   : > { %s921_s12 = smov %s805_s15  ;;  %15 = sbr.rel (!%p13_p13) target bundleno = 4 (0x4), region = 69 }
 0x20d   :  { %468 = vsyncpa [#allocation3], 1 }
 0x20e   :  { %470 = vsyncpa [#allocation3 + $0x1], 1 }
 0x20f   :  { %471 = vsyncpa [#allocation4], 1 }
 0x210   :  { %473 = vsyncpa [#allocation4 + $0x1], 1 }

</bundles_post_ra>
